<compile_context>
chip_gen: v7x
topology: tpu7x:2x2x1
jax: 0.10.0
libtpu: 0.0.40
codegen_flags: <defaults>
</compile_context>

<pallas_src>
import math

import jax
import jax.numpy as jnp
from jax.experimental import pallas as pl
from jax.experimental.pallas import tpu as pltpu


# ----------------------------------------------------------------------------
# VMEM budget helpers
# ----------------------------------------------------------------------------
def _vmem_capacity_bytes():
    try:
        info = pltpu.get_tpu_info()
        cap = int(getattr(info, "vmem_capacity_bytes", 0)) or (64 << 20)
    except Exception:
        cap = 64 << 20  # v7x floor — safe on every generation
    return cap


def _vmem_limit_bytes():
    # Explicit scoped-VMEM limit (~80% of physical). The default scoped limits
    # (16 MiB v5e / 32 MiB v6e,v7x) silently cap tile sizes far below what the
    # chip can actually hold.
    return int(_vmem_capacity_bytes() * 0.8)


def _pick_tn(F, vmem_limit):
    for tn in (512, 256, 128):
        # double-buffered bf16 weight tile must stay a small fraction of VMEM
        if F % tn == 0 and 4 * F * tn <= vmem_limit // 4:
            return tn
    return None


def _pick_tb(B, F, tn, vmem_limit):
    # Resident VMEM per batch tile (bytes):
    #   x   (bf16, 2 bufs): 4*tb*F      out   (f32, 2 bufs): 8*tb*F
    #   carry (bf16, 1 alloc): 4*tb*F   weight tile (bf16, 2 bufs): 4*F*tn
    headroom = vmem_limit - 4 * F * tn - (2 << 20)
    tb_cap = headroom // (16 * F) if F > 0 else B
    tb_cap = max(8, min(int(tb_cap), 512, B))
    if B >= 16:
        # keep >= 2 batch tiles so both TensorCores are used on v7x
        tb_cap = max(8, min(tb_cap, B // 2))
    best = None
    t = 8
    while t <= tb_cap:
        if B % t == 0:
            best = t
        t += 8
    return best if best is not None else B


# ----------------------------------------------------------------------------
# Fused small-model path: no grid, all weights resident, unrolled layer loop.
# ----------------------------------------------------------------------------
def _fused_forward(x, weights_t, *, vmem_limit):
    B, F = x.shape
    L = weights_t.shape[0]

    def kernel(x_ref, w_ref, o_ref):
        # Fully unrolled layer chain (static indices -> static VMEM slices).
        act = x_ref[...].astype(jnp.bfloat16)
        y = None
        for l in range(L):
            y = jnp.dot(act, w_ref[l], preferred_element_type=jnp.float32)
            act = y.astype(jnp.bfloat16)
        o_ref[...] = y.astype(o_ref.dtype)

    flops = 2 * L * B * F * F
    bytes_accessed = (
        weights_t.size * weights_t.dtype.itemsize
        + x.size * x.dtype.itemsize
        + B * F * x.dtype.itemsize
    )

    return pl.pallas_call(
        kernel,
        out_shape=jax.ShapeDtypeStruct((B, F), x.dtype),
        compiler_params=pltpu.CompilerParams(vmem_limit_bytes=vmem_limit),
        cost_estimate=pl.CostEstimate(
            flops=flops, transcendentals=0, bytes_accessed=bytes_accessed
        ),
    )(x, weights_t)


# ----------------------------------------------------------------------------
# Tiled streaming path: grid = (batch_tiles, n_layers, out_feature_tiles).
# ----------------------------------------------------------------------------
def _make_tiled_kernel(tn):
    def kernel(x_ref, w_ref, o_ref, carry_ref):
        # x_ref     : (tb, F)    bf16 input activations, resident per batch tile
        # w_ref     : (F, tn)    bf16 weight column tile (contiguous in HBM)
        # o_ref     : (tb, F)    output block, resident per batch tile
        # carry_ref : (2, tb, F) bf16 layer-to-layer ping-pong carry
        l = pl.program_id(1)
        j = pl.program_id(2)
        n_layers = pl.num_programs(1)
        col = pl.multiple_of(j * tn, tn)

        def layer_tile(lhs):
            y = jnp.dot(lhs, w_ref[...], preferred_element_type=jnp.float32)

            # Carry store only for non-final layers (layer l writes slab
            # (l+1) % 2, which layer l+1 reads).
            @pl.when(l != n_layers - 1)
            def _():
                carry_ref[(l + 1) % 2, :, pl.ds(col, tn)] = y.astype(jnp.bfloat16)

            # Only the last layer writes the (resident, lane-dense) output.
            @pl.when(l == n_layers - 1)
            def _():
                o_ref[:, pl.ds(col, tn)] = y.astype(o_ref.dtype)

        # Layer 0 reads the streamed input directly (no seed copy into the
        # carry); later layers read the carry slab of the previous layer.
        @pl.when(l == 0)
        def _():
            layer_tile(x_ref[...])

        @pl.when(l != 0)
        def _():
            layer_tile(carry_ref[l % 2])

    return kernel


def _tiled_forward(x, weights_t, *, tn=None, tb=None):
    B, F = x.shape
    L = weights_t.shape[0]
    vmem_limit = _vmem_limit_bytes()

    if tn is None:
        tn = _pick_tn(F, vmem_limit)
    assert tn is not None and F % tn == 0, f"F={F} must be divisible by tn={tn}"
    if tb is None:
        tb = _pick_tb(B, F, tn, vmem_limit)
    assert B % tb == 0, f"B={B} must be divisible by tb={tb}"

    # Tile-contiguous weight layout: (L, F//tn, F, tn) so each streamed
    # (F, tn) bf16 tile is one contiguous HBM region (full DMA efficiency).
    w_tiles = weights_t.reshape(L, F, F // tn, tn).transpose(0, 2, 1, 3)
    # bf16 input once in the wrapper: halves x's resident VMEM / HBM bytes and
    # removes any per-step cast of the MXU LHS inside the kernel.
    x16 = x.astype(jnp.bfloat16)

    flops = 2 * L * B * F * F
    bytes_accessed = (
        weights_t.size * weights_t.dtype.itemsize
        + x16.size * x16.dtype.itemsize
        + B * F * x.dtype.itemsize
    )

    return pl.pallas_call(
        _make_tiled_kernel(tn),
        out_shape=jax.ShapeDtypeStruct((B, F), x.dtype),
        grid_spec=pltpu.PrefetchScalarGridSpec(
            num_scalar_prefetch=0,
            grid=(B // tb, L, F // tn),
            in_specs=[
                # Activations: resident per batch tile (2-D block -> 2 indices).
                pl.BlockSpec((tb, F), lambda b, l, j: (b, 0)),
                # Weights: stream contiguous (F, tn) tiles; layer / tile dims
                # squeezed out of the kernel view.
                pl.BlockSpec((None, None, F, tn), lambda b, l, j: (l, j, 0, 0)),
            ],
            out_specs=pl.BlockSpec((tb, F), lambda b, l, j: (b, 0)),
            scratch_shapes=[
                pltpu.VMEM((2, tb, F), jnp.bfloat16),  # ping-pong layer carry
            ],
        ),
        compiler_params=pltpu.CompilerParams(
            # batch tiles are independent (megacore); layer/tile chain is not.
            dimension_semantics=("parallel", "arbitrary", "arbitrary"),
            vmem_limit_bytes=vmem_limit,
        ),
        cost_estimate=pl.CostEstimate(
            flops=flops, transcendentals=0, bytes_accessed=bytes_accessed
        ),
    )(x16, w_tiles)


# ----------------------------------------------------------------------------
# Public wrapper.
# ----------------------------------------------------------------------------
def mymodel_forward(x, weights_t, *, tn=None, tb=None, force_path=None):
    """x: (B, F); weights_t: (n_layers, F, F) with each slice = W_l.T (bf16)."""
    B, F = x.shape
    L, F_in, F_out = weights_t.shape
    assert F_in == F and F_out == F

    vmem_limit = _vmem_limit_bytes()

    # Fused-path footprint: resident weights + in/out/intermediate activations.
    w_bytes = weights_t.size * weights_t.dtype.itemsize
    act_bytes = B * F * (x.dtype.itemsize + x.dtype.itemsize + 4)
    fused_thresh = min(vmem_limit // 2, 32 << 20)
    small = (w_bytes + act_bytes) <= fused_thresh

    if force_path is not None:
        use_fused = force_path == "fused"
    else:
        use_fused = small or (F % 128 != 0)  # tiled path needs lane-aligned F

    if use_fused:
        return _fused_forward(x, weights_t, vmem_limit=vmem_limit)
    return _tiled_forward(x, weights_t, tn=tn, tb=tb)


def init_params(key, n_features, n_layers, dtype=jnp.bfloat16):
    """Mirror nn.Linear kaiming-uniform bound 1/sqrt(in); returns (L, in, out) = W.T,
    stored bf16 so the kernel streams half the HBM bytes and feeds the MXU natively."""
    bound = 1.0 / math.sqrt(n_features)
    keys = jax.random.split(key, n_layers)
    w_t = []
    for k in keys:
        w = jax.random.uniform(
            k, (n_features, n_features), jnp.float32, minval=-bound, maxval=bound
        )  # PyTorch layout (out, in)
        w_t.append(w.T)  # store transposed (in, out)
    return jnp.stack(w_t, axis=0).astype(dtype)


def _reference(x, weights_t):
    """Pure-JAX reference with the same dtype discipline as the kernels
    (bf16 operands, f32 accumulate, bf16 layer carry, last layer kept f32)."""
    act = x.astype(jnp.bfloat16)
    y = None
    for l in range(weights_t.shape[0]):
        y = jnp.dot(act, weights_t[l], preferred_element_type=jnp.float32)
        act = y.astype(jnp.bfloat16)
    return y.astype(x.dtype)


if __name__ == "__main__":
    key = jax.random.PRNGKey(0)
    kx1, kw1, kx2, kw2, kx3, kw3 = jax.random.split(key, 6)

    # --- Test 1: toy demo shapes -> fused single-step path -------------------
    B1, F1, L1 = 8, 128, 3
    x1 = jax.random.normal(kx1, (B1, F1), jnp.float32)
    w1 = init_params(kw1, F1, L1)
    out1 = jax.block_until_ready(mymodel_forward(x1, w1))
    ref1 = _reference(x1, w1)
    assert out1.shape == (B1, F1)
    assert jnp.allclose(out1, ref1, atol=2e-2, rtol=2e-2), "fused path mismatch"

    # --- Test 2: forced tiled streaming path (2 batch tiles x 4 layers x
    #     2 column tiles: exercises the dynamic ping-pong carry, the l==0
    #     input branch and the last-layer output writes) ----------------------
    B2, F2, L2 = 32, 256, 4
    x2 = jax.random.normal(kx2, (B2, F2), jnp.float32)
    w2 = init_params(kw2, F2, L2)
    out2 = jax.block_until_ready(
        mymodel_forward(x2, w2, force_path="tiled", tn=128, tb=16)
    )
    ref2 = _reference(x2, w2)
    assert out2.shape == (B2, F2)
    assert jnp.allclose(out2, ref2, atol=2e-2, rtol=2e-2), "tiled path mismatch"

    # --- Test 3: tiled path with odd layer count / single batch & column tile
    B3, F3, L3 = 16, 128, 3
    x3 = jax.random.normal(kx3, (B3, F3), jnp.float32)
    w3 = init_params(kw3, F3, L3)
    out3 = jax.block_until_ready(
        mymodel_forward(x3, w3, force_path="tiled", tn=128, tb=16)
    )
    ref3 = _reference(x3, w3)
    assert out3.shape == (B3, F3)
    assert jnp.allclose(out3, ref3, atol=2e-2, rtol=2e-2), "tiled (odd L) mismatch"

    print("KERNEL_OK")
</pallas_src>

<mosaic_0001>
module attributes {stable_mosaic.version = 11 : i64} {
  func.func @kernel(%arg0: memref<8x128xf32, #tpu.memory_space<vmem>>, %arg1: memref<3x128x128xbf16, #tpu.memory_space<vmem>>, %arg2: memref<8x128xf32, #tpu.memory_space<vmem>>) attributes {dimension_semantics = [], scalar_prefetch = 0 : i64, scratch_operands = 0 : i64, tpu.core_type = #tpu.core_type<tc>} {
    %c0 = arith.constant 0 : index
    %c0_0 = arith.constant 0 : index
    %0 = vector.load %arg0[%c0, %c0_0] : memref<8x128xf32, #tpu.memory_space<vmem>>, vector<8x128xf32>
    %1 = arith.truncf %0 : vector<8x128xf32> to vector<8x128xbf16>
    %c0_1 = arith.constant 0 : index
    %c0_2 = arith.constant 0 : index
    %c0_3 = arith.constant 0 : index
    %2 = vector.load %arg1[%c0_1, %c0_2, %c0_3] : memref<3x128x128xbf16, #tpu.memory_space<vmem>>, vector<1x128x128xbf16>
    %3 = vector.shape_cast %2 : vector<1x128x128xbf16> to vector<128x128xbf16>
    %cst = arith.constant dense<0.000000e+00> : vector<8x128xf32>
    %4 = tpu.matmul %1, %3, %cst {dimension_numbers = #tpu.dot_dimension_numbers<[1], [0], [0], [1], [0, 0, 1, 1], [], []>} : vector<8x128xbf16>, vector<128x128xbf16>, vector<8x128xf32> -> vector<8x128xf32>
    %5 = arith.truncf %4 : vector<8x128xf32> to vector<8x128xbf16>
    %c1 = arith.constant 1 : index
    %c0_4 = arith.constant 0 : index
    %c0_5 = arith.constant 0 : index
    %6 = vector.load %arg1[%c1, %c0_4, %c0_5] : memref<3x128x128xbf16, #tpu.memory_space<vmem>>, vector<1x128x128xbf16>
    %7 = vector.shape_cast %6 : vector<1x128x128xbf16> to vector<128x128xbf16>
    %cst_6 = arith.constant dense<0.000000e+00> : vector<8x128xf32>
    %8 = tpu.matmul %5, %7, %cst_6 {dimension_numbers = #tpu.dot_dimension_numbers<[1], [0], [0], [1], [0, 0, 1, 1], [], []>} : vector<8x128xbf16>, vector<128x128xbf16>, vector<8x128xf32> -> vector<8x128xf32>
    %9 = arith.truncf %8 : vector<8x128xf32> to vector<8x128xbf16>
    %c2 = arith.constant 2 : index
    %c0_7 = arith.constant 0 : index
    %c0_8 = arith.constant 0 : index
    %10 = vector.load %arg1[%c2, %c0_7, %c0_8] : memref<3x128x128xbf16, #tpu.memory_space<vmem>>, vector<1x128x128xbf16>
    %11 = vector.shape_cast %10 : vector<1x128x128xbf16> to vector<128x128xbf16>
    %cst_9 = arith.constant dense<0.000000e+00> : vector<8x128xf32>
    %12 = tpu.matmul %9, %11, %cst_9 {dimension_numbers = #tpu.dot_dimension_numbers<[1], [0], [0], [1], [0, 0, 1, 1], [], []>} : vector<8x128xbf16>, vector<128x128xbf16>, vector<8x128xf32> -> vector<8x128xf32>
    %c0_10 = arith.constant 0 : index
    %c0_11 = arith.constant 0 : index
    %13 = vector.load %arg2[%c0_10, %c0_11] : memref<8x128xf32, #tpu.memory_space<vmem>>, vector<8x128xf32>
    tpu.vector_store %arg2[%c0_10, %c0_11], %12 {strides = array<i32>} : memref<8x128xf32, #tpu.memory_space<vmem>>, vector<8x128xf32>,
    return
  }
}

</mosaic_0001>

<bundles_post_ra>
// kernel: tpu_custom_call.1
= control target key start
LH: loop header
LB: loop body
LE: loop exit
PB: predicated region body
PF: predicated region fallthrough
CT: control target
= control target key end

     0   :  { %7 = vsyncpa [#allocation3], 0  ;;  %s683_s0 = inlined_call_operand.hbm [shape: f32[8,128], index: 0, kind: input, shape index: {}]   ;;  %s684_s1 = inlined_call_operand.hbm [shape: bf16[3,128,128], index: 1, kind: input, shape index: {}]   ;;  %s685_s2 = inlined_call_operand.hbm [shape: f32[8,128], index: 2, kind: output, shape index: {}]  }
   0x1   :  { %8 = vsyncpa [#allocation6], 0 }
   0x2   :  { %9 = vsyncpa [#allocation4], 0  ;;  %s588_s9 = smov [#allocation2]   ;;  %s589_s11 = smov [#allocation5]  }
   0x3   :  { %s16_s10 = sshll.u32 %s588_s9, 4  ;;  %s25_s12 = sshll.u32 %s589_s11, 4  ;;  %s17_s10 = int_to_ptr.vmem [resolvable:$true] %s16_s10  ;;  %s610_s12 = int_to_ptr.vmem [resolvable:$true] %s25_s12 }
   0x4   :  { %s516_s15 = scalar_lea.hbm %s683_s0, 128 }
   0x5   :  { %p517_p0 = scmp.ne.s32.totalorder %s683_s0, %s516_s15  ;;  %p520_p1 = scmp.lt.u32.totalorder %s516_s15, %s683_s0 }
   0x7   :  { %p522_p2 = pnand %p520_p1, %p517_p0 }
   0x9   :  { %525 = shalt.err (!%p522_p2)
}
   0xa   :  { %s526_s20 = scalar_lea.vmem %s17_s10, 128  ;;  %p531_p4 = scmp.lt.s32.totalorder %s17_s10, %s17_s10 }
   0xb   :  { %p527_p3 = scmp.ne.s32.totalorder %s17_s10, %s526_s20  ;;  %p532_p5 = scmp.lt.s32.totalorder %s526_s20, %s526_s20 }
   0xd   :  { %p533_p6 = por %p532_p5, %p531_p4 }
   0xf   :  { %p534_p7 = pnand %p533_p6, %p527_p3 }
  0x11   :  { %537 = shalt.err (!%p534_p7)
}
  0x12   :  { %19 = dma.hbm_to_vmem [thread:$0]  %s683_s0, 128, %s17_s10, [#allocation3]  }
  0x13   :  { %s538_s25 = scalar_lea.hbm %s684_s1, 3072 }
  0x14   :  { %p539_p8 = scmp.ne.s32.totalorder %s684_s1, %s538_s25  ;;  %p542_p9 = scmp.lt.u32.totalorder %s538_s25, %s684_s1 }
  0x16   :  { %p544_p10 = pnand %p542_p9, %p539_p8 }
  0x18   :  { %547 = shalt.err (!%p544_p10)
}
  0x19   :  { %s548_s30 = scalar_lea.vmem %s610_s12, 3072  ;;  %p553_p12 = scmp.lt.s32.totalorder %s610_s12, %s610_s12 }
  0x1a   :  { %p549_p11 = scmp.ne.s32.totalorder %s610_s12, %s548_s30  ;;  %p554_p13 = scmp.lt.s32.totalorder %s548_s30, %s548_s30 }
  0x1c   :  { %p555_p0 = por %p554_p13, %p553_p12 }
  0x1e   :  { %p556_p1 = pnand %p555_p0, %p549_p11 }
  0x20   :  { %559 = shalt.err (!%p556_p1)
}
  0x21   :  { %s590_s0 = smov 64   ;;  %s591_s3 = smov 4  }
  0x22   :  { %31 = dma.hbm_to_vmem [thread:$0]  %s684_s1, 3072, %s610_s12, [#allocation6], %s590_s0, %s590_s0, %s591_s3  }
  0x23   :  { %582 = dma.done.wait [#allocation3], 128  }
  0x24   :  { %583 = vsyncadd [#allocation3], 4294967168 }
  0x25   :  { %584 = dma.done.wait [#allocation6], 3072  }
  0x26   :  { %585 = vsyncadd [#allocation6], 4294964224  ;;  %v592_v0 = vmov 0.0   ;;  %vm593_vm0 = vmmov 0   ;;  %v492_v1 = vld [vmem:[#allocation5] sm:$0xff]   ;;  %v493_v2 = vld [vmem:[#allocation5 + $0x8] sm:$0xff]  }
  0x27   :  { %425 = vmatprep.subr.bf16.mxu0 %v592_v0  ;;  %441 = vmatprep.mubr.msk.bf16.mxu0 %vm593_vm0, %v592_v0  ;;  %v494_v3 = vld [vmem:[#allocation5 + $0x10] sm:$0xff]   ;;  %v500_v4 = vld [vmem:[#allocation5 + $0x40] sm:$0xff]   ;;  %v495_v5 = vld [vmem:[#allocation5 + $0x18] sm:$0xff]   ;;  %s594_s1 = smov [#allocation7]  }
  0x28   :  { %445 = vmatprep.subr.bf16.mxu1 %v592_v0  ;;  %461 = vmatprep.mubr.msk.bf16.mxu1 %vm593_vm0, %v592_v0  ;;  %v501_v6 = vld [vmem:[#allocation5 + $0x48] sm:$0xff]   ;;  %v496_v7 = vld [vmem:[#allocation5 + $0x20] sm:$0xff]   ;;  %v502_v8 = vld [vmem:[#allocation5 + $0x50] sm:$0xff]   ;;  %s364_s6 = sshll.u32 %s594_s1, 4  ;;  %s365_s6 = int_to_ptr.vmem [resolvable:$true] %s364_s6 }
  0x29   :  { %426 = vmatpush3.bf16.msra.mxu0 %v492_v1  ;;  %446 = vmatpush3.bf16.msra.mxu1 %v500_v4  ;;  %v497_v9 = vld [vmem:[#allocation5 + $0x28] sm:$0xff]   ;;  %v503_v10 = vld [vmem:[#allocation5 + $0x58] sm:$0xff]   ;;  %v498_v11 = vld [vmem:[#allocation5 + $0x30] sm:$0xff]   ;;  %s560_s7 = scalar_lea.vmem %s365_s6, 128  ;;  %p565_p3 = scmp.lt.s32.totalorder %s365_s6, %s365_s6 }
  0x2a   :  { %427 = vmatprep.subr.bf16.mxu0 %v592_v0  ;;  %447 = vmatprep.subr.bf16.mxu1 %v592_v0  ;;  %v504_v12 = vld [vmem:[#allocation5 + $0x60] sm:$0xff]   ;;  %v499_v13 = vld [vmem:[#allocation5 + $0x38] sm:$0xff]   ;;  %v505_v15 = vld [vmem:[#allocation5 + $0x68] sm:$0xff]   ;;  %p561_p2 = scmp.ne.s32.totalorder %s365_s6, %s560_s7  ;;  %p566_p4 = scmp.lt.s32.totalorder %s560_s7, %s560_s7 }
  0x2b   :  { %v39_v14 = vld [vmem:[#allocation2] sm:$0xff]  ;;  %v506_v17 = vld [vmem:[#allocation5 + $0x70] sm:$0xff]   ;;  %v508_v19 = vld [vmem:[#allocation5 + $0x80] sm:$0xff]  }
  0x2c   :  { %v40_v16 = vpack.c.bf16 %v39_v14, %v39_v14  ;;  %v507_v18 = vld [vmem:[#allocation5 + $0x78] sm:$0xff]   ;;  %v509_v20 = vld [vmem:[#allocation5 + $0x88] sm:$0xff]   ;;  %v510_v21 = vld [vmem:[#allocation5 + $0x90] sm:$0xff]   ;;  %p567_p5 = por %p566_p4, %p565_p3 }
  0x2d   :  { %428 = vmatpush3.bf16.msra.mxu0 %v493_v2  ;;  %448 = vmatpush3.bf16.msra.mxu1 %v501_v6  ;;  %v511_v22 = vld [vmem:[#allocation5 + $0x98] sm:$0xff]   ;;  %v512_v23 = vld [vmem:[#allocation5 + $0xa0] sm:$0xff]   ;;  %v513_v24 = vld [vmem:[#allocation5 + $0xa8] sm:$0xff]  }
  0x2e   :  { %429 = vmatprep.subr.bf16.mxu0 %v592_v0  ;;  %449 = vmatprep.subr.bf16.mxu1 %v592_v0  ;;  %v514_v25 = vld [vmem:[#allocation5 + $0xb0] sm:$0xff]   ;;  %v515_v31 = vld [vmem:[#allocation5 + $0xb8] sm:$0xff]   ;;  %p568_p6 = pnand %p567_p5, %p561_p2 }
  0x31   :  { %430 = vmatpush3.bf16.msra.mxu0 %v494_v3  ;;  %450 = vmatpush3.bf16.msra.mxu1 %v502_v8 }
  0x32   :  { %431 = vmatprep.subr.bf16.mxu0 %v592_v0  ;;  %451 = vmatprep.subr.bf16.mxu1 %v592_v0 }
  0x35   :  { %432 = vmatpush3.bf16.msra.mxu0 %v495_v5  ;;  %452 = vmatpush3.bf16.msra.mxu1 %v503_v10 }
  0x36   :  { %433 = vmatprep.subr.bf16.mxu0 %v592_v0  ;;  %453 = vmatprep.subr.bf16.mxu1 %v592_v0 }
  0x39   :  { %434 = vmatpush3.bf16.msra.mxu0 %v496_v7  ;;  %454 = vmatpush3.bf16.msra.mxu1 %v504_v12 }
  0x3a   :  { %435 = vmatprep.subr.bf16.mxu0 %v592_v0  ;;  %455 = vmatprep.subr.bf16.mxu1 %v592_v0 }
  0x3d   :  { %436 = vmatpush3.bf16.msra.mxu0 %v497_v9  ;;  %456 = vmatpush3.bf16.msra.mxu1 %v505_v15 }
  0x3e   :  { %437 = vmatprep.subr.bf16.mxu0 %v592_v0  ;;  %457 = vmatprep.subr.bf16.mxu1 %v592_v0 }
  0x41   :  { %438 = vmatpush3.bf16.msra.mxu0 %v498_v11  ;;  %458 = vmatpush3.bf16.msra.mxu1 %v506_v17 }
  0x42   :  { %439 = vmatprep.subr.bf16.mxu0 %v592_v0  ;;  %459 = vmatprep.subr.bf16.mxu1 %v592_v0 }
  0x45   :  { %440 = vmatpush3.bf16.msra.mxu0 %v499_v13  ;;  %460 = vmatpush3.bf16.msra.mxu1 %v507_v18 }
  0x46   :  { %465 = vmatprep.subr.bf16.mxu0 %v592_v0 }
  0x48   :  { %442 = vmatmul.mubr.bf16.vlgmr.msra.gmra.mrb[0].mxu0 %v40_v16 }
  0x49   :  { %481 = vmatprep.mubr.msk.bf16.mxu0 %vm593_vm0, %v592_v0  ;;  %466 = vmatpush3.bf16.msra.mxu0 %v508_v19 }
  0x4a   :  { %467 = vmatprep.subr.bf16.mxu0 %v592_v0 }
  0x4d   :  { %468 = vmatpush3.bf16.msra.mxu0 %v509_v20 }
  0x4e   :  { %469 = vmatprep.subr.bf16.mxu0 %v592_v0 }
  0x51   :  { %470 = vmatpush3.bf16.msra.mxu0 %v510_v21 }
  0x52   :  { %471 = vmatprep.subr.bf16.mxu0 %v592_v0 }
  0x55   :  { %472 = vmatpush3.bf16.msra.mxu0 %v511_v22 }
  0x56   :  { %473 = vmatprep.subr.bf16.mxu0 %v592_v0 }
  0x59   :  { %474 = vmatpush3.bf16.msra.mxu0 %v512_v23 }
  0x5a   :  { %475 = vmatprep.subr.bf16.mxu0 %v592_v0 }
  0x5d   :  { %476 = vmatpush3.bf16.msra.mxu0 %v513_v24 }
  0x5e   :  { %477 = vmatprep.subr.bf16.mxu0 %v592_v0 }
  0x61   :  { %478 = vmatpush3.bf16.msra.mxu0 %v514_v25 }
  0x62   :  { %479 = vmatprep.subr.bf16.mxu0 %v592_v0 }
  0x65   :  { %480 = vmatpush3.bf16.msra.mxu0 %v515_v31 }
 0x11b   :  { %v139_v26 = vpop.f32.mrb[0].mxu0 }
 0x11c   :  { %v145_v27 = vpack.c.bf16 %v139_v26, %v139_v26  ;;  %v443_v28 = vpop.f32.mrb[1].mxu0 }
 0x11d   :  { %v142_v29 = vpop.f32.mrb[2].mxu0 }
 0x11e   :  { %v444_v30 = vpop.f32.mrb[3].mxu0  ;;  %462 = vmatmul.mubr.bf16.vlgmr.msra.gmra.mrb[0].mxu1 %v145_v27 }
 0x1f1   :  { %v245_v32 = vpop.f32.mrb[0].mxu1 }
 0x1f2   :  { %v251_v33 = vpack.c.bf16 %v245_v32, %v245_v32  ;;  %v463_v34 = vpop.f32.mrb[1].mxu1 }
 0x1f3   :  { %v248_v35 = vpop.f32.mrb[2].mxu1 }
 0x1f4   :  { %v464_v36 = vpop.f32.mrb[3].mxu1  ;;  %482 = vmatmul.mubr.bf16.vlgmr.msra.gmra.mrb[4].mxu0 %v251_v33 }
 0x2c7   :  { %v351_v37 = vpop.f32.mrb[4].mxu0 }
 0x2c8   :  { %357 = vst [vmem:[#allocation7] sm:$0xff] %v351_v37  ;;  %v483_v38 = vpop.f32.mrb[5].mxu0 }
 0x2c9   :  { %v354_v39 = vpop.f32.mrb[6].mxu0 }
 0x2ca   :  { %571 = shalt.err (!%p568_p6)
}
 0x2cb   :  { %s572_s10 = scalar_lea.hbm %s685_s2, 128 }
 0x2cc   :  { %p573_p7 = scmp.ne.s32.totalorder %s685_s2, %s572_s10  ;;  %p576_p8 = scmp.lt.u32.totalorder %s572_s10, %s685_s2 }
 0x2ce   :  { %p578_p9 = pnand %p576_p8, %p573_p7 }
 0x2d0   :  { %581 = shalt.err (!%p578_p9)
}
 0x2d1   :  { %367 = dma.vmem_to_hbm [thread:$0]  %s365_s6, 128, %s685_s2, [#allocation4]   ;;  %v484_v40 = vpop.f32.mrb[7].mxu0 }
 0x2d2   :  { %586 = dma.done.wait [#allocation4], 128  }
 0x2d3   :  { %587 = vsyncadd [#allocation4], 4294967168 }
 0x2d4   :  { %371 = vsyncpa [#allocation3], 1 }
 0x2d5   :  { %372 = vsyncpa [#allocation6], 1 }
 0x2d6   :  { %373 = vsyncpa [#allocation4], 1 }

</bundles_post_ra>
